<compile_context>
chip_gen: v7x
topology: tpu7x:2x2x1
jax: 0.10.0
libtpu: 0.0.40
codegen_flags: <defaults>
</compile_context>

<pallas_src>
import jax
import jax.numpy as jnp
from jax.experimental import pallas as pl
from jax.experimental.pallas import tpu as pltpu


def _round_up(x, m):
    return ((x + m - 1) // m) * m


def _vmem_capacity_bytes():
    """Per-TensorCore VMEM capacity; conservative 64 MiB fallback (v7x-class)."""
    try:
        return int(pltpu.get_tpu_info().vmem_capacity_bytes)
    except Exception:
        return 64 * 1024 * 1024


def _choose_tm(M, tm_max=1024):
    """Pick the row tile minimizing (padded rows + per-step overhead)."""
    m8 = _round_up(M, 8)
    best = None
    for t in (1024, 512, 256, 128, 64, 32, 16, 8):
        if t > tm_max:
            continue
        t_eff = min(t, m8)              # multiple of 8 by construction
        m_pad = _round_up(M, t_eff)
        steps = m_pad // t_eff
        # ~0.35 us fixed cost per grid step ~ a few hundred extra rows of DMA.
        cost = m_pad + 256 * steps
        if best is None or cost < best[0]:
            best = (cost, t_eff, m_pad)
    return best[1], best[2]


def task_head_kernel(x_ref, w1_ref, b1_ref, w2_ref, b2_ref, o_ref):
    # In-kernel bf16 cast of x: HBM read stays one f32 pass, MXU gets bf16.
    xb = x_ref[...].astype(jnp.bfloat16)
    h = jnp.dot(xb, w1_ref[...], preferred_element_type=jnp.float32)
    h = jnp.maximum(h + b1_ref[...], 0.0)        # bias + ReLU in f32 (v5e-safe)
    # Dropout(p=0.1) is identity at inference time.
    y = jnp.dot(h.astype(w2_ref.dtype), w2_ref[...],
                preferred_element_type=jnp.float32)
    y = y + b2_ref[...]
    # Store only the true output columns (masked store; avoids padded writeback).
    n_out = o_ref.shape[-1]
    o_ref[...] = y[:, :n_out].astype(o_ref.dtype)


def prepare_task_head_params(w1, b1, w2, b2):
    """One-time weight prep (hoisted off the per-call path): lane-pad the second
    linear to a multiple of 128 and cast matmul operands to bf16; biases f32."""
    input_dim, hidden_dim = w1.shape
    output_dim = w2.shape[1]
    out_pad = _round_up(max(output_dim, 128), 128)
    if out_pad != output_dim:
        w2 = jnp.pad(w2, ((0, 0), (0, out_pad - output_dim)))
        b2 = jnp.pad(b2, ((0, 0), (0, out_pad - output_dim)))
    return dict(
        w1=w1.astype(jnp.bfloat16),
        b1=b1.reshape(1, hidden_dim).astype(jnp.float32),
        w2=w2.astype(jnp.bfloat16),
        b2=b2.reshape(1, out_pad).astype(jnp.float32),
        output_dim=output_dim,
    )


def task_head_forward(x, params, *, tm_max=1024):
    """x: (M, input_dim) f32; params from prepare_task_head_params.
    Returns (M, output_dim) in x.dtype."""
    M, input_dim = x.shape
    w1, b1, w2, b2 = params["w1"], params["b1"], params["w2"], params["b2"]
    output_dim = params["output_dim"]
    hidden_dim = w1.shape[1]
    out_pad = w2.shape[1]
    out_dtype = x.dtype

    tm, m_pad = _choose_tm(M, tm_max)
    vmem_cap = _vmem_capacity_bytes()

    # 64 MiB-class VMEM => v7x-style dual TensorCore: keep the parallel batch
    # axis at >= 2 grid steps so both cores get work (negligible cost elsewhere).
    if vmem_cap <= 64 * 1024 * 1024 and m_pad // tm == 1 and tm >= 128:
        tm = _round_up(tm // 2, 8)
        m_pad = _round_up(M, tm)

    if m_pad != M:
        x = jnp.pad(x, ((0, m_pad - M), (0, 0)))

    grid = (m_pad // tm,)
    single = dict(pipeline_mode=pl.Buffered(1))  # constant block index -> 1 buffer

    in_specs = [
        pl.BlockSpec((tm, input_dim), lambda i: (i, 0)),                    # x tile
        pl.BlockSpec((input_dim, hidden_dim), lambda i: (0, 0), **single),  # W1
        pl.BlockSpec((1, hidden_dim), lambda i: (0, 0), **single),          # b1
        pl.BlockSpec((hidden_dim, out_pad), lambda i: (0, 0), **single),    # W2 (pad)
        pl.BlockSpec((1, out_pad), lambda i: (0, 0), **single),             # b2 (pad)
    ]
    out_specs = pl.BlockSpec((tm, output_dim), lambda i: (i, 0))            # unpadded

    x_isize = jnp.dtype(x.dtype).itemsize
    out_isize = jnp.dtype(out_dtype).itemsize
    flops = 2 * m_pad * (input_dim * hidden_dim + hidden_dim * out_pad)
    bytes_accessed = (m_pad * input_dim * x_isize
                      + w1.size * 2 + w2.size * 2 + b1.size * 4 + b2.size * 4
                      + m_pad * output_dim * out_isize)
    cost = pl.CostEstimate(flops=flops, transcendentals=0,
                           bytes_accessed=bytes_accessed)

    # VMEM guard: resident single-buffered weights + double-buffered x/out tiles
    # + f32 intermediates, 2x headroom, clamped below this chip's physical VMEM.
    vmem_needed = (input_dim * hidden_dim * 2 + hidden_dim * out_pad * 2
                   + (hidden_dim + out_pad) * 4
                   + 2 * tm * input_dim * x_isize
                   + 2 * tm * output_dim * out_isize
                   + tm * hidden_dim * 4 + tm * out_pad * 4)
    vmem_limit = max(min(2 * vmem_needed, vmem_cap - (16 << 20)), 32 << 20)

    out = pl.pallas_call(
        task_head_kernel,
        out_shape=jax.ShapeDtypeStruct((m_pad, output_dim), out_dtype),
        grid_spec=pltpu.PrefetchScalarGridSpec(
            num_scalar_prefetch=0,
            grid=grid,
            in_specs=in_specs,
            out_specs=out_specs,
        ),
        compiler_params=pltpu.CompilerParams(
            dimension_semantics=("parallel",),
            vmem_limit_bytes=int(vmem_limit),
        ),
        cost_estimate=cost,
    )(x, w1, b1, w2, b2)

    return out[:M] if m_pad != M else out


def init_params(key, input_dim, hidden_dim, output_dim, dtype=jnp.float32):
    """Deterministic init mirroring nn.Linear default (uniform(-1/sqrt(fan_in), ...))."""
    k1, k2, k3, k4 = jax.random.split(key, 4)
    lim1 = 1.0 / (input_dim ** 0.5)
    lim2 = 1.0 / (hidden_dim ** 0.5)
    w1 = jax.random.uniform(k1, (input_dim, hidden_dim), dtype, -lim1, lim1)
    b1 = jax.random.uniform(k2, (1, hidden_dim), dtype, -lim1, lim1)
    w2 = jax.random.uniform(k3, (hidden_dim, output_dim), dtype, -lim2, lim2)
    b2 = jax.random.uniform(k4, (1, output_dim), dtype, -lim2, lim2)
    return w1, b1, w2, b2


if __name__ == "__main__":
    input_dim, hidden_dim, output_dim = 32, 128, 4
    batch = 8

    key = jax.random.PRNGKey(0)
    kx, kp = jax.random.split(key)
    x = jax.random.normal(kx, (batch, input_dim), jnp.float32)
    w1, b1, w2, b2 = init_params(kp, input_dim, hidden_dim, output_dim)

    params = prepare_task_head_params(w1, b1, w2, b2)   # one-time weight prep
    out = task_head_forward(x, params)
    out = jax.block_until_ready(out)
    assert out.shape == (batch, output_dim)

    # Precision-matched reference (same bf16 operands, f32 accumulation,
    # eval-mode dropout == identity).
    xb, w1b, w2b = (a.astype(jnp.bfloat16) for a in (x, w1, w2))
    h_ref = jnp.maximum(
        jnp.dot(xb, w1b, preferred_element_type=jnp.float32) + b1, 0.0)
    ref = jnp.dot(h_ref.astype(jnp.bfloat16), w2b,
                  preferred_element_type=jnp.float32) + b2
    assert jnp.allclose(out, ref, atol=1e-3, rtol=1e-3), \
        float(jnp.max(jnp.abs(out - ref)))

    # Loose check against the full-f32 reference (bounds bf16 quantization error).
    ref_f32 = jnp.maximum(x @ w1 + b1, 0.0) @ w2 + b2
    assert jnp.allclose(out, ref_f32, atol=2e-2, rtol=2e-2), \
        float(jnp.max(jnp.abs(out - ref_f32)))

    print("KERNEL_OK")
</pallas_src>

<mosaic_0001>
module attributes {stable_mosaic.version = 11 : i64} {
  func.func @task_head_kernel(%arg0: i32, %arg1: memref<8x32xf32, #tpu.memory_space<vmem>>, %arg2: memref<32x128xbf16, #tpu.memory_space<vmem>>, %arg3: memref<1x128xf32, #tpu.memory_space<vmem>>, %arg4: memref<128x128xbf16, #tpu.memory_space<vmem>>, %arg5: memref<1x128xf32, #tpu.memory_space<vmem>>, %arg6: memref<8x4xf32, #tpu.memory_space<vmem>>) attributes {dimension_semantics = [#tpu.dimension_semantics<parallel>], iteration_bounds = array<i64: 1>, scalar_prefetch = 0 : i64, scratch_operands = 0 : i64, tpu.core_type = #tpu.core_type<tc>, window_params = [{transform_indices = @transform_0, window_bounds = array<i64: 8, 32>}, {pipeline_mode = #tpu.pipeline_mode<synchronous>, transform_indices = @transform_1, window_bounds = array<i64: 32, 128>}, {pipeline_mode = #tpu.pipeline_mode<synchronous>, transform_indices = @transform_2, window_bounds = array<i64: 1, 128>}, {pipeline_mode = #tpu.pipeline_mode<synchronous>, transform_indices = @transform_3, window_bounds = array<i64: 128, 128>}, {pipeline_mode = #tpu.pipeline_mode<synchronous>, transform_indices = @transform_4, window_bounds = array<i64: 1, 128>}, {transform_indices = @transform_5, window_bounds = array<i64: 8, 4>}]} {
    %c0 = arith.constant 0 : index
    %c0_0 = arith.constant 0 : index
    %0 = vector.load %arg1[%c0, %c0_0] : memref<8x32xf32, #tpu.memory_space<vmem>>, vector<8x32xf32>
    %1 = arith.truncf %0 : vector<8x32xf32> to vector<8x32xbf16>
    %c0_1 = arith.constant 0 : index
    %c0_2 = arith.constant 0 : index
    %2 = vector.load %arg2[%c0_1, %c0_2] : memref<32x128xbf16, #tpu.memory_space<vmem>>, vector<32x128xbf16>
    %cst = arith.constant dense<0.000000e+00> : vector<8x128xf32>
    %3 = tpu.matmul %1, %2, %cst {dimension_numbers = #tpu.dot_dimension_numbers<[1], [0], [0], [1], [0, 0, 1, 1], [], []>} : vector<8x32xbf16>, vector<32x128xbf16>, vector<8x128xf32> -> vector<8x128xf32>
    %c0_3 = arith.constant 0 : index
    %c0_4 = arith.constant 0 : index
    %4 = vector.load %arg3[%c0_3, %c0_4] : memref<1x128xf32, #tpu.memory_space<vmem>>, vector<1x128xf32>
    %5 = vector.broadcast %4 : vector<1x128xf32> to vector<8x128xf32>
    %6 = arith.addf %3, %5 : vector<8x128xf32>
    %cst_5 = arith.constant 0.000000e+00 : f32
    %7 = vector.broadcast %cst_5 : f32 to vector<8x128xf32>
    %8 = arith.maximumf %6, %7 : vector<8x128xf32>
    %9 = arith.truncf %8 : vector<8x128xf32> to vector<8x128xbf16>
    %c0_6 = arith.constant 0 : index
    %c0_7 = arith.constant 0 : index
    %10 = vector.load %arg4[%c0_6, %c0_7] : memref<128x128xbf16, #tpu.memory_space<vmem>>, vector<128x128xbf16>
    %cst_8 = arith.constant dense<0.000000e+00> : vector<8x128xf32>
    %11 = tpu.matmul %9, %10, %cst_8 {dimension_numbers = #tpu.dot_dimension_numbers<[1], [0], [0], [1], [0, 0, 1, 1], [], []>} : vector<8x128xbf16>, vector<128x128xbf16>, vector<8x128xf32> -> vector<8x128xf32>
    %c0_9 = arith.constant 0 : index
    %c0_10 = arith.constant 0 : index
    %12 = vector.load %arg5[%c0_9, %c0_10] : memref<1x128xf32, #tpu.memory_space<vmem>>, vector<1x128xf32>
    %13 = vector.broadcast %12 : vector<1x128xf32> to vector<8x128xf32>
    %14 = arith.addf %11, %13 : vector<8x128xf32>
    %15 = vector.extract_strided_slice %14 {offsets = [0, 0], sizes = [8, 4], strides = [1, 1]} : vector<8x128xf32> to vector<8x4xf32>
    %c0_11 = arith.constant 0 : index
    %c0_12 = arith.constant 0 : index
    %16 = vector.load %arg6[%c0_11, %c0_12] : memref<8x4xf32, #tpu.memory_space<vmem>>, vector<8x4xf32>
    tpu.vector_store %arg6[%c0_11, %c0_12], %15 {strides = array<i32>} : memref<8x4xf32, #tpu.memory_space<vmem>>, vector<8x4xf32>,
    return
  }
  func.func @transform_0(%arg0: i32) -> (i32, i32) {
    %c0_i32 = arith.constant 0 : i32
    %c0_i32_0 = arith.constant 0 : i32
    return %arg0, %c0_i32 : i32, i32
  }
  func.func @transform_1(%arg0: i32) -> (i32, i32) {
    %c0_i32 = arith.constant 0 : i32
    %c0_i32_0 = arith.constant 0 : i32
    %c0_i32_1 = arith.constant 0 : i32
    return %c0_i32, %c0_i32_0 : i32, i32
  }
  func.func @transform_2(%arg0: i32) -> (i32, i32) {
    %c0_i32 = arith.constant 0 : i32
    %c0_i32_0 = arith.constant 0 : i32
    %c0_i32_1 = arith.constant 0 : i32
    return %c0_i32, %c0_i32_0 : i32, i32
  }
  func.func @transform_3(%arg0: i32) -> (i32, i32) {
    %c0_i32 = arith.constant 0 : i32
    %c0_i32_0 = arith.constant 0 : i32
    %c0_i32_1 = arith.constant 0 : i32
    return %c0_i32, %c0_i32_0 : i32, i32
  }
  func.func @transform_4(%arg0: i32) -> (i32, i32) {
    %c0_i32 = arith.constant 0 : i32
    %c0_i32_0 = arith.constant 0 : i32
    %c0_i32_1 = arith.constant 0 : i32
    return %c0_i32, %c0_i32_0 : i32, i32
  }
  func.func @transform_5(%arg0: i32) -> (i32, i32) {
    %c0_i32 = arith.constant 0 : i32
    %c0_i32_0 = arith.constant 0 : i32
    return %arg0, %c0_i32 : i32, i32
  }
}

</mosaic_0001>

<bundles_post_ra>
// kernel: tpu_custom_call.1
= control target key start
LH: loop header
LB: loop body
LE: loop exit
PB: predicated region body
PF: predicated region fallthrough
CT: control target
= control target key end

     0   :  { %10 = vsyncpa [#allocation3], 0  ;;  %s478_s0 = inlined_call_operand.hbm [shape: f32[8,32], index: 0, kind: input, shape index: {}]   ;;  %s479_s1 = inlined_call_operand.hbm [shape: bf16[32,128], index: 1, kind: input, shape index: {}]   ;;  %s480_s2 = inlined_call_operand.vmem [shape: f32[1,128], index: 2, kind: input, shape index: {}]   ;;  %s481_s3 = inlined_call_operand.hbm [shape: bf16[128,128], index: 3, kind: input, shape index: {}]   ;;  %s482_s4 = inlined_call_operand.vmem [shape: f32[1,128], index: 4, kind: input, shape index: {}]   ;;  %s483_s5 = inlined_call_operand.vmem [shape: f32[8,4], index: 5, kind: output, shape index: {}]  }
   0x1   :  { %11 = vsyncpa [#allocation5], 0  ;;  %s390_s18 = smov [#allocation4]   ;;  %s320_s22 = scalar_lea.hbm %s479_s1, 256 }
   0x2   :  { %s27_s19 = sshll.u32 %s390_s18, 4  ;;  %p321_p0 = scmp.ne.s32.totalorder %s479_s1, %s320_s22  ;;  %s28_s19 = int_to_ptr.vmem [resolvable:$true] %s27_s19 }
   0x3   :  { %p324_p1 = scmp.lt.u32.totalorder %s320_s22, %s479_s1 }
   0x5   :  { %p326_p2 = pnand %p324_p1, %p321_p0 }
   0x7   :  { %329 = shalt.err (!%p326_p2)
}
   0x8   :  { %s330_s27 = scalar_lea.vmem %s28_s19, 256  ;;  %p335_p4 = scmp.lt.s32.totalorder %s28_s19, %s28_s19 }
   0x9   :  { %p331_p3 = scmp.ne.s32.totalorder %s28_s19, %s330_s27  ;;  %p336_p5 = scmp.lt.s32.totalorder %s330_s27, %s330_s27 }
   0xb   :  { %p337_p6 = por %p336_p5, %p335_p4 }
   0xd   :  { %p338_p7 = pnand %p337_p6, %p331_p3 }
   0xf   :  { %341 = shalt.err (!%p338_p7)
}
  0x10   :  { %s391_s28 = smov 64   ;;  %s392_s29 = smov 4  }
  0x11   :  { %33 = dma.hbm_to_vmem [thread:$0]  %s479_s1, 256, %s28_s19, [#allocation5], %s391_s28, %s391_s28, %s392_s29  }
  0x12   :  { %s393_s7 = smov [#allocation2]   ;;  %s394_s9 = smov [#allocation6]  }
  0x13   :  { %s18_s8 = sshll.u32 %s393_s7, 4  ;;  %s41_s10 = sshll.u32 %s394_s9, 4  ;;  %s19_s8 = int_to_ptr.vmem [resolvable:$true] %s18_s8  ;;  %s42_s10 = int_to_ptr.vmem [resolvable:$true] %s41_s10 }
  0x14   :  { %s342_s13 = scalar_lea.hbm %s478_s0, 128 }
  0x15   :  { %p343_p8 = scmp.ne.s32.totalorder %s478_s0, %s342_s13  ;;  %p346_p9 = scmp.lt.u32.totalorder %s342_s13, %s478_s0 }
  0x17   :  { %p348_p10 = pnand %p346_p9, %p343_p8 }
  0x19   :  { %351 = shalt.err (!%p348_p10)
}
  0x1a   :  { %s352_s1 = scalar_lea.vmem %s19_s8, 128  ;;  %p357_p12 = scmp.lt.s32.totalorder %s19_s8, %s19_s8 }
  0x1b   :  { %p353_p11 = scmp.ne.s32.totalorder %s19_s8, %s352_s1  ;;  %p358_p13 = scmp.lt.s32.totalorder %s352_s1, %s352_s1 }
  0x1d   :  { %p359_p0 = por %p358_p13, %p357_p12 }
  0x1f   :  { %p360_p1 = pnand %p359_p0, %p353_p11 }
  0x21   :  { %363 = shalt.err (!%p360_p1)
}
  0x22   :  { %21 = dma.hbm_to_vmem [thread:$0]  %s478_s0, 128, %s19_s8, [#allocation3]  }
  0x23   :  { %s364_s22 = scalar_lea.hbm %s481_s3, 1024 }
  0x24   :  { %p365_p2 = scmp.ne.s32.totalorder %s481_s3, %s364_s22  ;;  %p368_p3 = scmp.lt.u32.totalorder %s364_s22, %s481_s3 }
  0x26   :  { %p370_p4 = pnand %p368_p3, %p365_p2 }
  0x28   :  { %373 = shalt.err (!%p370_p4)
}
  0x29   :  { %s374_s27 = scalar_lea.vmem %s42_s10, 1024  ;;  %p379_p6 = scmp.lt.s32.totalorder %s42_s10, %s42_s10 }
  0x2a   :  { %p375_p5 = scmp.ne.s32.totalorder %s42_s10, %s374_s27  ;;  %p380_p7 = scmp.lt.s32.totalorder %s374_s27, %s374_s27 }
  0x2c   :  { %p381_p8 = por %p380_p7, %p379_p6 }
  0x2e   :  { %p382_p9 = pnand %p381_p8, %p375_p5 }
  0x30   :  { %385 = shalt.err (!%p382_p9)
}
  0x31   :  { %47 = dma.hbm_to_vmem [thread:$0]  %s481_s3, 1024, %s42_s10, [#allocation5], %s391_s28, %s391_s28, %s392_s29  }
  0x32   :  { %386 = dma.done.wait [#allocation3], 128  }
  0x33   :  { %387 = vsyncadd [#allocation3], 4294967168 }
  0x34   :  { %388 = dma.done.wait [#allocation5], 1280  }
  0x35   :  { %389 = vsyncadd [#allocation5], 4294966016  ;;  %v395_v0 = vmov 0.0   ;;  %vm396_vm0 = vmmov 0   ;;  %v310_v1 = vld [vmem:[#allocation4] sm:$0xff]   ;;  %v311_v2 = vld [vmem:[#allocation4 + $0x8] sm:$0xff]  }
  0x36   :  { %275 = vmatprep.subr.bf16.mxu0 %v395_v0  ;;  %279 = vmatprep.mubr.msk.bf16.mxu0 %vm396_vm0, %v395_v0  ;;  %v60_v3 = vld [vmem:[#allocation2] sm:$0xff]  ;;  %v312_v4 = vld [vmem:[#allocation6] sm:$0xff]   ;;  %vm85_vm1 = vcmask 261120   ;;  %v314_v7 = vld [vmem:[#allocation6 + $0x10] sm:$0xff]   ;;  %vm242_vm2 = vcmask 31744  }
  0x37   :  { %283 = vmatprep.subr.bf16.mxu1 %v395_v0  ;;  %299 = vmatprep.mubr.msk.bf16.mxu1 %vm396_vm0, %v395_v0  ;;  %v61_v5 = vpack.c.bf16 %v60_v3, %v60_v3  ;;  %v313_v6 = vld [vmem:[#allocation6 + $0x8] sm:$0xff]   ;;  %v315_v8 = vld [vmem:[#allocation6 + $0x18] sm:$0xff]   ;;  %v316_v9 = vld [vmem:[#allocation6 + $0x20] sm:$0xff]  }
  0x38   :  { %276 = vmatpush3.bf16.msra.mxu0 %v310_v1  ;;  %284 = vmatpush3.bf16.msra.mxu1 %v312_v4  ;;  %v317_v10 = vld [vmem:[#allocation6 + $0x28] sm:$0xff]   ;;  %v318_v11 = vld [vmem:[#allocation6 + $0x30] sm:$0xff]   ;;  %v319_v12 = vld [vmem:[#allocation6 + $0x38] sm:$0xff]  }
  0x39   :  { %277 = vmatprep.subr.bf16.mxu0 %v395_v0  ;;  %285 = vmatprep.subr.bf16.mxu1 %v395_v0  ;;  %v250_v13 = vld [vmem:[%s480_s2] ss:$0 sm:$0xff] }
  0x3a   :  { %v254_v21 = vld [vmem:[%s482_s4] ss:$0 sm:$0xff] }
  0x3c   :  { %278 = vmatpush3.bf16.msra.mxu0 %v311_v2  ;;  %286 = vmatpush3.bf16.msra.mxu1 %v313_v6 }
  0x3d   :  { %287 = vmatprep.subr.bf16.mxu1 %v395_v0 }
  0x3f   :  { %280 = vmatmul.mubr.msk.bf16.vlgmr.msra.gmra.mrb[0].mxu0 %vm85_vm1, %v61_v5 }
  0x40   :  { %288 = vmatpush3.bf16.msra.mxu1 %v314_v7 }
  0x41   :  { %289 = vmatprep.subr.bf16.mxu1 %v395_v0 }
  0x44   :  { %290 = vmatpush3.bf16.msra.mxu1 %v315_v8 }
  0x45   :  { %291 = vmatprep.subr.bf16.mxu1 %v395_v0 }
  0x48   :  { %292 = vmatpush3.bf16.msra.mxu1 %v316_v9 }
  0x49   :  { %293 = vmatprep.subr.bf16.mxu1 %v395_v0 }
  0x4c   :  { %294 = vmatpush3.bf16.msra.mxu1 %v317_v10 }
  0x4d   :  { %295 = vmatprep.subr.bf16.mxu1 %v395_v0 }
  0x50   :  { %296 = vmatpush3.bf16.msra.mxu1 %v318_v11 }
  0x51   :  { %297 = vmatprep.subr.bf16.mxu1 %v395_v0 }
  0x54   :  { %298 = vmatpush3.bf16.msra.mxu1 %v319_v12 }
 0x112   :  { %v123_v14 = vpop.f32.mrb[0].mxu0 }
 0x113   :  { %v124_v15 = vadd.f32 %v250_v13, %v123_v14  ;;  %v281_v16 = vpop.f32.mrb[1].mxu0 }
 0x114   :  { %v126_v17 = vpop.f32.mrb[2].mxu0 }
 0x115   :  { %v129_v18 = vmax.f32 %v124_v15, 0.0  ;;  %v282_v19 = vpop.f32.mrb[3].mxu0 }
 0x117   :  { %v130_v20 = vpack.c.bf16 %v129_v18, %v129_v18 }
 0x119   :  { %300 = vmatmul.mubr.bf16.vlgmr.msra.gmra.mrb[0].mxu1 %v130_v20 }
 0x1ec   :  { %v236_v22 = vpop.f32.mrb[0].mxu1 }
 0x1ed   :  { %v237_v23 = vadd.f32 %v254_v21, %v236_v22  ;;  %v301_v24 = vpop.f32.mrb[1].mxu1 }
 0x1ee   :  { %v239_v25 = vpop.f32.mrb[2].mxu1 }
 0x1ef   :  { %243 = vst.msk [vmem:[%s483_s5] sm:$0xff] %vm242_vm2, %v237_v23  ;;  %v302_v26 = vpop.f32.mrb[3].mxu1 }
 0x1f0   :  { %248 = vsyncpa [#allocation3], 1 }
 0x1f1   :  { %249 = vsyncpa [#allocation5], 1 }

</bundles_post_ra>
